<compile_context>
chip_gen: v6e
topology: v6e:2x2x1
jax: 0.10.0
libtpu: 0.0.40
codegen_flags: <defaults>
</compile_context>

<pallas_src>
import jax
import jax.numpy as jnp
from jax import lax
from jax.experimental import pallas as pl
from jax.experimental.pallas import tpu as pltpu

EPS_BN = 1e-5
SIG_CLAMP = 1e-4


def gated_gcn_kernel(h_ref, e_ref, src_ref, dst_ref, snn_ref, sne_ref,
                     Wh_ref, bh_ref, Wc_ref, bc_ref, bn_ref,
                     h_out_ref, e_out_ref):
    N, D = h_ref.shape
    E = e_ref.shape[0]

    h = h_ref[...]                      # [N, D]
    e = e_ref[...]                      # [E, D]

    # ---- fused node projection (lane-dense [N, 4D]); columns = [Dh | Bh | Eh | Ah]
    HP = jnp.dot(h, Wh_ref[...], preferred_element_type=jnp.float32) + bh_ref[...]
    Ce = jnp.dot(e, Wc_ref[...], preferred_element_type=jnp.float32) + bc_ref[...]

    # ---- incidence one-hots built in-kernel from index vectors (cheap VPU compares)
    node_ids = lax.broadcasted_iota(jnp.int32, (E, N), 1)
    S = (node_ids == src_ref[...]).astype(jnp.float32)    # [E, N] edge -> src node
    T = (node_ids == dst_ref[...]).astype(jnp.float32)    # [E, N] edge -> dst node

    # ---- fused gathers: src side needs [Dh | Bh] (one matmul), dst side needs Eh
    SG = jnp.dot(S, HP[:, :2 * D], preferred_element_type=jnp.float32)         # [E, 2D]
    Eh_dst = jnp.dot(T, HP[:, 2 * D:3 * D], preferred_element_type=jnp.float32)  # [E, D]

    Dh_src = SG[:, :D]
    Bh_src = SG[:, D:]

    # message: e_ij = Ce + Dh_j + Eh_i
    e_ij = Ce + Dh_src + Eh_dst
    sigma = jnp.clip(jax.nn.sigmoid(e_ij), SIG_CLAMP, 1.0 - SIG_CLAMP)

    # ---- fused scatter-sum over incoming edges: T^T @ [sigma*Bh_src | sigma] -> [N, 2D]
    red = lax.dot_general(T, jnp.concatenate([sigma * Bh_src, sigma], axis=1),
                          (((0,), (0,)), ((), ())),
                          preferred_element_type=jnp.float32)
    numer = red[:, :D]
    denom = red[:, D:]

    has_in = denom > 0.0                 # exact float zeros for zero in-degree nodes
    h_agg = HP[:, 3 * D:] + numer / jnp.where(has_in, denom, 1.0)
    # DGL update_all: nodes with zero in-degree keep their original 'h'
    h_new = jnp.where(has_in, h_agg, h) * snn_ref[...]    # [N,1] broadcast
    e_new = e_ij * sne_ref[...]                            # [E,1] broadcast

    def bn_relu(x, gamma, beta, inv_rows):
        # single-pass batch stats (training-mode BN, biased variance)
        s1 = jnp.sum(x, axis=0, keepdims=True)
        s2 = jnp.sum(x * x, axis=0, keepdims=True)
        mean = s1 * inv_rows
        var = jnp.maximum(s2 * inv_rows - mean * mean, 0.0)
        xhat = (x - mean) * lax.rsqrt(var + EPS_BN)
        return jnp.maximum(xhat * gamma + beta, 0.0)

    # BN -> ReLU -> residual
    h_out_ref[...] = h + bn_relu(h_new, bn_ref[0], bn_ref[1], 1.0 / N)
    e_out_ref[...] = e + bn_relu(e_new, bn_ref[2], bn_ref[3], 1.0 / E)


def gated_gcn_layer(h, e, src, dst, snorm_n, snorm_e, params):
    N, D = h.shape
    E = e.shape[0]
    W, b, bn = params["W"], params["b"], params["bn"]

    # Fuse A/B/D/E into one [D, 4D] weight; column layout [Dh | Bh | Eh | Ah]
    Wh = jnp.concatenate([W[3], W[1], W[4], W[0]], axis=1)   # [D, 4D]
    bh = jnp.concatenate([b[3], b[1], b[4], b[0]], axis=1)   # [1, 4D]
    Wc, bc = W[2], b[2]

    src2 = src.astype(jnp.int32).reshape(E, 1)
    dst2 = dst.astype(jnp.int32).reshape(E, 1)

    vmem = pl.BlockSpec(memory_space=pltpu.MemorySpace.VMEM)

    flops = 2 * (N * D * 4 * D          # fused node projection
                 + E * D * D            # Ce projection
                 + E * N * 2 * D        # src gather (Dh | Bh)
                 + E * N * D            # dst gather (Eh)
                 + E * N * 2 * D)       # scatter-sum (numer | denom)
    bytes_accessed = 4 * (2 * N * D + 2 * E * D      # h, e in / out
                          + 2 * E + N + E            # indices + snorms
                          + 4 * D * D + 4 * D        # fused weights + biases
                          + D * D + D + 4 * D)       # Wc, bc, bn params

    return pl.pallas_call(
        gated_gcn_kernel,
        out_shape=(jax.ShapeDtypeStruct((N, D), h.dtype),
                   jax.ShapeDtypeStruct((E, D), e.dtype)),
        in_specs=[vmem] * 11,
        out_specs=(vmem, vmem),
        compiler_params=pltpu.CompilerParams(vmem_limit_bytes=32 * 1024 * 1024),
        cost_estimate=pl.CostEstimate(flops=flops,
                                      transcendentals=E * D + 2 * D,
                                      bytes_accessed=bytes_accessed),
    )(h, e, src2, dst2, snorm_n, snorm_e, Wh, bh, Wc, bc, bn)


def reference_jax(h, e, src, dst, snorm_n, snorm_e, params):
    """Plain-JAX reference with identical semantics (for a correctness check)."""
    N, D = h.shape
    W, b, bn = params["W"], params["b"], params["bn"]
    Ah = h @ W[0] + b[0]
    Bh = h @ W[1] + b[1]
    Ce = e @ W[2] + b[2]
    Dh = h @ W[3] + b[3]
    Eh = h @ W[4] + b[4]
    e_ij = Ce + Dh[src] + Eh[dst]
    sigma = jnp.clip(jax.nn.sigmoid(e_ij), SIG_CLAMP, 1.0 - SIG_CLAMP)
    numer = jnp.zeros((N, D)).at[dst].add(sigma * Bh[src])
    denom = jnp.zeros((N, D)).at[dst].add(sigma)
    has_in = denom > 0.0
    h_agg = Ah + numer / jnp.where(has_in, denom, 1.0)
    h_new = jnp.where(has_in, h_agg, h) * snorm_n
    e_new = e_ij * snorm_e

    def bn_relu(x, gamma, beta):
        m = x.mean(0, keepdims=True)
        v = ((x - m) ** 2).mean(0, keepdims=True)
        return jnp.maximum((x - m) / jnp.sqrt(v + EPS_BN) * gamma + beta, 0.0)

    return h + bn_relu(h_new, bn[0], bn[1]), e + bn_relu(e_new, bn[2], bn[3])


def init_params(key, dim):
    """Deterministic init matching the module shapes: 5 Linear(dim, dim) + 2 BN(dim)."""
    gain = jnp.sqrt(2.0)                              # calculate_gain('relu')
    std = gain * jnp.sqrt(2.0 / (dim + dim))          # xavier_normal_
    kw, kb = jax.random.split(key)
    W = std * jax.random.normal(kw, (5, dim, dim), dtype=jnp.float32)  # [in, out] (pre-T)
    bound = 1.0 / jnp.sqrt(dim)                       # nn.Linear default bias init
    b = jax.random.uniform(kb, (5, 1, dim), minval=-bound, maxval=bound,
                           dtype=jnp.float32)
    # BN params: [gamma_h, beta_h, gamma_e, beta_e]
    bn = jnp.stack([jnp.ones((1, dim)), jnp.zeros((1, dim)),
                    jnp.ones((1, dim)), jnp.zeros((1, dim))]).astype(jnp.float32)
    return {"W": W, "b": b, "bn": bn}


if __name__ == "__main__":
    N, E, D = 16, 48, 32   # nodes, edges, hidden (input_dim == output_dim for residual)

    key = jax.random.PRNGKey(0)
    k_h, k_e, k_p, k_extra = jax.random.split(key, 4)

    h = jax.random.normal(k_h, (N, D), dtype=jnp.float32)
    e = jax.random.normal(k_e, (E, D), dtype=jnp.float32)

    # deterministic graph: a ring (guarantees every node has in-degree >= 1) + extra edges
    ring_src = jnp.arange(N, dtype=jnp.int32)
    ring_dst = (ring_src + 1) % N
    extra = E - N
    extra_src = jax.random.randint(k_extra, (extra,), 0, N, dtype=jnp.int32)
    extra_dst = (extra_src * 3 + 5) % N
    src = jnp.concatenate([ring_src, extra_src])
    dst = jnp.concatenate([ring_dst, extra_dst])

    snorm_n = jnp.full((N, 1), 1.0 / jnp.sqrt(N), dtype=jnp.float32)
    snorm_e = jnp.full((E, 1), 1.0 / jnp.sqrt(E), dtype=jnp.float32)

    params = init_params(k_p, D)

    h_out, e_out = gated_gcn_layer(h, e, src, dst, snorm_n, snorm_e, params)
    jax.block_until_ready((h_out, e_out))

    h_ref, e_ref = reference_jax(h, e, src, dst, snorm_n, snorm_e, params)
    assert jnp.allclose(h_out, h_ref, rtol=1e-4, atol=1e-4), "node features mismatch"
    assert jnp.allclose(e_out, e_ref, rtol=1e-4, atol=1e-4), "edge features mismatch"

    print("KERNEL_OK")
</pallas_src>

<mosaic_0001>
module attributes {stable_mosaic.version = 11 : i64} {
  func.func @gated_gcn_kernel(%arg0: memref<16x32xf32, #tpu.memory_space<vmem>>, %arg1: memref<48x32xf32, #tpu.memory_space<vmem>>, %arg2: memref<48x1xi32, #tpu.memory_space<vmem>>, %arg3: memref<48x1xi32, #tpu.memory_space<vmem>>, %arg4: memref<16x1xf32, #tpu.memory_space<vmem>>, %arg5: memref<48x1xf32, #tpu.memory_space<vmem>>, %arg6: memref<32x128xf32, #tpu.memory_space<vmem>>, %arg7: memref<1x128xf32, #tpu.memory_space<vmem>>, %arg8: memref<32x32xf32, #tpu.memory_space<vmem>>, %arg9: memref<1x32xf32, #tpu.memory_space<vmem>>, %arg10: memref<4x1x32xf32, #tpu.memory_space<vmem>>, %arg11: memref<16x32xf32, #tpu.memory_space<vmem>>, %arg12: memref<48x32xf32, #tpu.memory_space<vmem>>) attributes {dimension_semantics = [], scalar_prefetch = 0 : i64, scratch_operands = 0 : i64, tpu.core_type = #tpu.core_type<tc>} {
    %c0 = arith.constant 0 : index
    %c0_0 = arith.constant 0 : index
    %0 = vector.load %arg0[%c0, %c0_0] : memref<16x32xf32, #tpu.memory_space<vmem>>, vector<16x32xf32>
    %c0_1 = arith.constant 0 : index
    %c0_2 = arith.constant 0 : index
    %1 = vector.load %arg1[%c0_1, %c0_2] : memref<48x32xf32, #tpu.memory_space<vmem>>, vector<48x32xf32>
    %c0_3 = arith.constant 0 : index
    %c0_4 = arith.constant 0 : index
    %2 = vector.load %arg6[%c0_3, %c0_4] : memref<32x128xf32, #tpu.memory_space<vmem>>, vector<32x128xf32>
    %cst = arith.constant dense<0.000000e+00> : vector<16x128xf32>
    %3 = tpu.matmul %0, %2, %cst {dimension_numbers = #tpu.dot_dimension_numbers<[1], [0], [0], [1], [0, 0, 1, 1], [], []>} : vector<16x32xf32>, vector<32x128xf32>, vector<16x128xf32> -> vector<16x128xf32>
    %c0_5 = arith.constant 0 : index
    %c0_6 = arith.constant 0 : index
    %4 = vector.load %arg7[%c0_5, %c0_6] : memref<1x128xf32, #tpu.memory_space<vmem>>, vector<1x128xf32>
    %5 = vector.broadcast %4 : vector<1x128xf32> to vector<16x128xf32>
    %6 = arith.addf %3, %5 : vector<16x128xf32>
    %c0_7 = arith.constant 0 : index
    %c0_8 = arith.constant 0 : index
    %7 = vector.load %arg8[%c0_7, %c0_8] : memref<32x32xf32, #tpu.memory_space<vmem>>, vector<32x32xf32>
    %cst_9 = arith.constant dense<0.000000e+00> : vector<48x32xf32>
    %8 = tpu.matmul %1, %7, %cst_9 {dimension_numbers = #tpu.dot_dimension_numbers<[1], [0], [0], [1], [0, 0, 1, 1], [], []>} : vector<48x32xf32>, vector<32x32xf32>, vector<48x32xf32> -> vector<48x32xf32>
    %c0_10 = arith.constant 0 : index
    %c0_11 = arith.constant 0 : index
    %9 = vector.load %arg9[%c0_10, %c0_11] : memref<1x32xf32, #tpu.memory_space<vmem>>, vector<1x32xf32>
    %10 = vector.broadcast %9 : vector<1x32xf32> to vector<48x32xf32>
    %11 = arith.addf %8, %10 : vector<48x32xf32>
    %12 = tpu.iota {dimensions = array<i32: 1>} : vector<48x16xi32>
    %c0_12 = arith.constant 0 : index
    %c0_13 = arith.constant 0 : index
    %13 = vector.load %arg2[%c0_12, %c0_13] : memref<48x1xi32, #tpu.memory_space<vmem>>, vector<48x1xi32>
    %14 = vector.broadcast %13 : vector<48x1xi32> to vector<48x16xi32>
    %15 = arith.cmpi eq, %12, %14 : vector<48x16xi32>
    %16 = arith.extui %15 : vector<48x16xi1> to vector<48x16xi32>
    %17 = arith.sitofp %16 : vector<48x16xi32> to vector<48x16xf32>
    %c0_14 = arith.constant 0 : index
    %c0_15 = arith.constant 0 : index
    %18 = vector.load %arg3[%c0_14, %c0_15] : memref<48x1xi32, #tpu.memory_space<vmem>>, vector<48x1xi32>
    %19 = vector.broadcast %18 : vector<48x1xi32> to vector<48x16xi32>
    %20 = arith.cmpi eq, %12, %19 : vector<48x16xi32>
    %21 = arith.extui %20 : vector<48x16xi1> to vector<48x16xi32>
    %22 = arith.sitofp %21 : vector<48x16xi32> to vector<48x16xf32>
    %23 = vector.extract_strided_slice %6 {offsets = [0, 0], sizes = [16, 64], strides = [1, 1]} : vector<16x128xf32> to vector<16x64xf32>
    %cst_16 = arith.constant dense<0.000000e+00> : vector<48x64xf32>
    %24 = tpu.matmul %17, %23, %cst_16 {dimension_numbers = #tpu.dot_dimension_numbers<[1], [0], [0], [1], [0, 0, 1, 1], [], []>} : vector<48x16xf32>, vector<16x64xf32>, vector<48x64xf32> -> vector<48x64xf32>
    %25 = vector.extract_strided_slice %6 {offsets = [0, 64], sizes = [16, 32], strides = [1, 1]} : vector<16x128xf32> to vector<16x32xf32>
    %cst_17 = arith.constant dense<0.000000e+00> : vector<48x32xf32>
    %26 = tpu.matmul %22, %25, %cst_17 {dimension_numbers = #tpu.dot_dimension_numbers<[1], [0], [0], [1], [0, 0, 1, 1], [], []>} : vector<48x16xf32>, vector<16x32xf32>, vector<48x32xf32> -> vector<48x32xf32>
    %27 = vector.extract_strided_slice %24 {offsets = [0, 0], sizes = [48, 32], strides = [1, 1]} : vector<48x64xf32> to vector<48x32xf32>
    %28 = vector.extract_strided_slice %24 {offsets = [0, 32], sizes = [48, 32], strides = [1, 1]} : vector<48x64xf32> to vector<48x32xf32>
    %29 = arith.addf %11, %27 : vector<48x32xf32>
    %30 = arith.addf %29, %26 : vector<48x32xf32>
    %31 = arith.negf %30 : vector<48x32xf32>
    %32 = math.exp %31 : vector<48x32xf32>
    %cst_18 = arith.constant 1.000000e+00 : f32
    %33 = vector.broadcast %cst_18 : f32 to vector<48x32xf32>
    %34 = arith.addf %33, %32 : vector<48x32xf32>
    %35 = arith.divf %33, %34 : vector<48x32xf32>
    %cst_19 = arith.constant 9.99999974E-5 : f32
    %cst_20 = arith.constant 0.999899983 : f32
    %36 = vector.broadcast %cst_19 : f32 to vector<48x32xf32>
    %37 = arith.maximumf %36, %35 : vector<48x32xf32>
    %38 = vector.broadcast %cst_20 : f32 to vector<48x32xf32>
    %39 = arith.minimumf %38, %37 : vector<48x32xf32>
    %40 = arith.mulf %39, %28 : vector<48x32xf32>
    %41 = tpu.concatenate %40, %39 in 1 : vector<48x32xf32>, vector<48x32xf32> -> vector<48x64xf32>
    %cst_21 = arith.constant dense<0.000000e+00> : vector<16x64xf32>
    %42 = tpu.matmul %22, %41, %cst_21 {dimension_numbers = #tpu.dot_dimension_numbers<[0], [0], [1], [1], [0, 1, 1, 1], [], []>} : vector<48x16xf32>, vector<48x64xf32>, vector<16x64xf32> -> vector<16x64xf32>
    %43 = vector.extract_strided_slice %42 {offsets = [0, 0], sizes = [16, 32], strides = [1, 1]} : vector<16x64xf32> to vector<16x32xf32>
    %44 = vector.extract_strided_slice %42 {offsets = [0, 32], sizes = [16, 32], strides = [1, 1]} : vector<16x64xf32> to vector<16x32xf32>
    %cst_22 = arith.constant 0.000000e+00 : f32
    %45 = vector.broadcast %cst_22 : f32 to vector<16x32xf32>
    %46 = arith.cmpf ogt, %44, %45 : vector<16x32xf32>
    %47 = vector.extract_strided_slice %6 {offsets = [0, 96], sizes = [16, 32], strides = [1, 1]} : vector<16x128xf32> to vector<16x32xf32>
    %cst_23 = arith.constant 1.000000e+00 : f32
    %48 = vector.broadcast %cst_23 : f32 to vector<16x32xf32>
    %49 = arith.select %46, %44, %48 : vector<16x32xi1>, vector<16x32xf32>
    %50 = arith.divf %43, %49 : vector<16x32xf32>
    %51 = arith.addf %47, %50 : vector<16x32xf32>
    %52 = arith.select %46, %51, %0 : vector<16x32xi1>, vector<16x32xf32>
    %c0_24 = arith.constant 0 : index
    %c0_25 = arith.constant 0 : index
    %53 = vector.load %arg4[%c0_24, %c0_25] : memref<16x1xf32, #tpu.memory_space<vmem>>, vector<16x1xf32>
    %54 = vector.broadcast %53 : vector<16x1xf32> to vector<16x32xf32>
    %55 = arith.mulf %52, %54 : vector<16x32xf32>
    %c0_26 = arith.constant 0 : index
    %c0_27 = arith.constant 0 : index
    %56 = vector.load %arg5[%c0_26, %c0_27] : memref<48x1xf32, #tpu.memory_space<vmem>>, vector<48x1xf32>
    %57 = vector.broadcast %56 : vector<48x1xf32> to vector<48x32xf32>
    %58 = arith.mulf %30, %57 : vector<48x32xf32>
    %c0_28 = arith.constant 0 : index
    %c0_29 = arith.constant 0 : index
    %c0_30 = arith.constant 0 : index
    %59 = vector.load %arg10[%c0_28, %c0_29, %c0_30] : memref<4x1x32xf32, #tpu.memory_space<vmem>>, vector<1x1x32xf32>
    %60 = vector.shape_cast %59 : vector<1x1x32xf32> to vector<1x32xf32>
    %c1 = arith.constant 1 : index
    %c0_31 = arith.constant 0 : index
    %c0_32 = arith.constant 0 : index
    %61 = vector.load %arg10[%c1, %c0_31, %c0_32] : memref<4x1x32xf32, #tpu.memory_space<vmem>>, vector<1x1x32xf32>
    %62 = vector.shape_cast %61 : vector<1x1x32xf32> to vector<1x32xf32>
    %cst_33 = arith.constant dense<0.000000e+00> : vector<32xf32>
    %63 = vector.multi_reduction <add>, %55, %cst_33 [0] : vector<16x32xf32> to vector<32xf32>
    %64 = vector.shape_cast %63 : vector<32xf32> to vector<1x32xf32>
    %65 = arith.mulf %55, %55 : vector<16x32xf32>
    %cst_34 = arith.constant dense<0.000000e+00> : vector<32xf32>
    %66 = vector.multi_reduction <add>, %65, %cst_34 [0] : vector<16x32xf32> to vector<32xf32>
    %67 = vector.shape_cast %66 : vector<32xf32> to vector<1x32xf32>
    %cst_35 = arith.constant 6.250000e-02 : f32
    %68 = vector.broadcast %cst_35 : f32 to vector<1x32xf32>
    %69 = arith.mulf %64, %68 : vector<1x32xf32>
    %cst_36 = arith.constant 6.250000e-02 : f32
    %70 = vector.broadcast %cst_36 : f32 to vector<1x32xf32>
    %71 = arith.mulf %67, %70 : vector<1x32xf32>
    %72 = arith.mulf %69, %69 : vector<1x32xf32>
    %73 = arith.subf %71, %72 : vector<1x32xf32>
    %cst_37 = arith.constant 0.000000e+00 : f32
    %74 = vector.broadcast %cst_37 : f32 to vector<1x32xf32>
    %75 = arith.maximumf %73, %74 : vector<1x32xf32>
    %76 = vector.broadcast %69 : vector<1x32xf32> to vector<16x32xf32>
    %77 = arith.subf %55, %76 : vector<16x32xf32>
    %cst_38 = arith.constant 9.99999974E-6 : f32
    %78 = vector.broadcast %cst_38 : f32 to vector<1x32xf32>
    %79 = arith.addf %75, %78 : vector<1x32xf32>
    %80 = math.rsqrt %79 : vector<1x32xf32>
    %81 = vector.broadcast %80 : vector<1x32xf32> to vector<16x32xf32>
    %82 = arith.mulf %77, %81 : vector<16x32xf32>
    %83 = vector.broadcast %60 : vector<1x32xf32> to vector<16x32xf32>
    %84 = arith.mulf %82, %83 : vector<16x32xf32>
    %85 = vector.broadcast %62 : vector<1x32xf32> to vector<16x32xf32>
    %86 = arith.addf %84, %85 : vector<16x32xf32>
    %cst_39 = arith.constant 0.000000e+00 : f32
    %87 = vector.broadcast %cst_39 : f32 to vector<16x32xf32>
    %88 = arith.maximumf %86, %87 : vector<16x32xf32>
    %89 = arith.addf %0, %88 : vector<16x32xf32>
    %c0_40 = arith.constant 0 : index
    %c0_41 = arith.constant 0 : index
    %90 = vector.load %arg11[%c0_40, %c0_41] : memref<16x32xf32, #tpu.memory_space<vmem>>, vector<16x32xf32>
    tpu.vector_store %arg11[%c0_40, %c0_41], %89 {strides = array<i32>} : memref<16x32xf32, #tpu.memory_space<vmem>>, vector<16x32xf32>,
    %c2 = arith.constant 2 : index
    %c0_42 = arith.constant 0 : index
    %c0_43 = arith.constant 0 : index
    %91 = vector.load %arg10[%c2, %c0_42, %c0_43] : memref<4x1x32xf32, #tpu.memory_space<vmem>>, vector<1x1x32xf32>
    %92 = vector.shape_cast %91 : vector<1x1x32xf32> to vector<1x32xf32>
    %c3 = arith.constant 3 : index
    %c0_44 = arith.constant 0 : index
    %c0_45 = arith.constant 0 : index
    %93 = vector.load %arg10[%c3, %c0_44, %c0_45] : memref<4x1x32xf32, #tpu.memory_space<vmem>>, vector<1x1x32xf32>
    %94 = vector.shape_cast %93 : vector<1x1x32xf32> to vector<1x32xf32>
    %cst_46 = arith.constant dense<0.000000e+00> : vector<32xf32>
    %95 = vector.multi_reduction <add>, %58, %cst_46 [0] : vector<48x32xf32> to vector<32xf32>
    %96 = vector.shape_cast %95 : vector<32xf32> to vector<1x32xf32>
    %97 = arith.mulf %58, %58 : vector<48x32xf32>
    %cst_47 = arith.constant dense<0.000000e+00> : vector<32xf32>
    %98 = vector.multi_reduction <add>, %97, %cst_47 [0] : vector<48x32xf32> to vector<32xf32>
    %99 = vector.shape_cast %98 : vector<32xf32> to vector<1x32xf32>
    %cst_48 = arith.constant 0.020833334 : f32
    %100 = vector.broadcast %cst_48 : f32 to vector<1x32xf32>
    %101 = arith.mulf %96, %100 : vector<1x32xf32>
    %cst_49 = arith.constant 0.020833334 : f32
    %102 = vector.broadcast %cst_49 : f32 to vector<1x32xf32>
    %103 = arith.mulf %99, %102 : vector<1x32xf32>
    %104 = arith.mulf %101, %101 : vector<1x32xf32>
    %105 = arith.subf %103, %104 : vector<1x32xf32>
    %cst_50 = arith.constant 0.000000e+00 : f32
    %106 = vector.broadcast %cst_50 : f32 to vector<1x32xf32>
    %107 = arith.maximumf %105, %106 : vector<1x32xf32>
    %108 = vector.broadcast %101 : vector<1x32xf32> to vector<48x32xf32>
    %109 = arith.subf %58, %108 : vector<48x32xf32>
    %cst_51 = arith.constant 9.99999974E-6 : f32
    %110 = vector.broadcast %cst_51 : f32 to vector<1x32xf32>
    %111 = arith.addf %107, %110 : vector<1x32xf32>
    %112 = math.rsqrt %111 : vector<1x32xf32>
    %113 = vector.broadcast %112 : vector<1x32xf32> to vector<48x32xf32>
    %114 = arith.mulf %109, %113 : vector<48x32xf32>
    %115 = vector.broadcast %92 : vector<1x32xf32> to vector<48x32xf32>
    %116 = arith.mulf %114, %115 : vector<48x32xf32>
    %117 = vector.broadcast %94 : vector<1x32xf32> to vector<48x32xf32>
    %118 = arith.addf %116, %117 : vector<48x32xf32>
    %cst_52 = arith.constant 0.000000e+00 : f32
    %119 = vector.broadcast %cst_52 : f32 to vector<48x32xf32>
    %120 = arith.maximumf %118, %119 : vector<48x32xf32>
    %121 = arith.addf %1, %120 : vector<48x32xf32>
    %c0_53 = arith.constant 0 : index
    %c0_54 = arith.constant 0 : index
    %122 = vector.load %arg12[%c0_53, %c0_54] : memref<48x32xf32, #tpu.memory_space<vmem>>, vector<48x32xf32>
    tpu.vector_store %arg12[%c0_53, %c0_54], %121 {strides = array<i32>} : memref<48x32xf32, #tpu.memory_space<vmem>>, vector<48x32xf32>,
    return
  }
}

</mosaic_0001>

<bundles_post_ra>
// kernel: tpu_custom_call.1
= control target key start
LH: loop header
LB: loop body
LE: loop exit
PB: predicated region body
PF: predicated region fallthrough
CT: control target
= control target key end

     0   :  { %vm60_vm0 = vcmask 261120   ;;  %v1335_v3 = vmov 0   ;;  %s1801_s0 = inlined_call_operand.vmem [shape: f32[16,32], index: 0, kind: input, shape index: {}]   ;;  %s1802_s1 = inlined_call_operand.vmem [shape: f32[48,32], index: 1, kind: input, shape index: {}]   ;;  %s1803_s2 = inlined_call_operand.vmem [shape: s32[48,1], index: 2, kind: input, shape index: {}]   ;;  %s1804_s3 = inlined_call_operand.vmem [shape: s32[48,1], index: 3, kind: input, shape index: {}]   ;;  %s1805_s4 = inlined_call_operand.vmem [shape: f32[16,1], index: 4, kind: input, shape index: {}]   ;;  %s1806_s5 = inlined_call_operand.vmem [shape: f32[48,1], index: 5, kind: input, shape index: {}]   ;;  %s1807_s6 = inlined_call_operand.vmem [shape: f32[32,128], index: 6, kind: input, shape index: {}]   ;;  %s1808_s7 = inlined_call_operand.vmem [shape: f32[1,128], index: 7, kind: input, shape index: {}]   ;;  %s1809_s8 = inlined_call_operand.vmem [shape: f32[32,32], index: 8, kind: input, shape index: {}]   ;;  %s1810_s9 = inlined_call_operand.vmem [shape: f32[1,32], index: 9, kind: input, shape index: {}]   ;;  %s1811_s10 = inlined_call_operand.vmem [shape: f32[4,1,32], index: 10, kind: input, shape index: {}]   ;;  %s1812_s11 = inlined_call_operand.hbm [shape: f32[16,32], index: 11, kind: output, shape index: {0}]   ;;  %s1813_s12 = inlined_call_operand.vmem [shape: f32[48,32], index: 12, kind: output, shape index: {1}]  }
   0x1   :  { %v52_v0 = vld [vmem:[%s1807_s6 + $0x18] sm:$0xff]  ;;  %v51_v1 = vld [vmem:[%s1807_s6 + $0x10] sm:$0xff]  ;;  %v1417_v2 = vld [vmem:[%s1801_s0] sm:$0xff]  ;;  %1279 = vset.pattern.permute.xlu0 %v1335_v3  ;;  %1280 = vset.pattern.permute.xlu1 %v1335_v3 }
   0x2   :  { %1202 = vmatprep.subr.mxu0 %v52_v0  ;;  %v50_v4 = vld [vmem:[%s1807_s6 + $0x8] sm:$0xff]  ;;  %1210 = vmatprep.mubr.msk.f32.mxu0 %vm60_vm0, %v1417_v2  ;;  %v268_v5 = vld [vmem:[%s1803_s2] sm:$0xff] }
   0x3   :  { %1203 = vmatpush3.msra.mxu0 %v52_v0  ;;  %v310_v6 = vld [vmem:[%s1804_s3] sm:$0xff]  ;;  %275 = vperm.xlu0 %1279, %v268_v5   ;;  %v269_v8 = vld [vmem:[%s1803_s2 + $0x8] sm:$0xff] }
   0x4   :  { %1204 = vmatprep.subr.mxu0 %v51_v1  ;;  %v49_v7 = vld [vmem:[%s1807_s6] sm:$0xff]  ;;  %317 = vperm.xlu1 %1280, %v310_v6  }
   0x5   :  { %1205 = vmatpush3.msra.mxu0 %v51_v1 }
   0x6   :  { %1206 = vmatprep.subr.mxu0 %v50_v4 }
   0x7   :  { %18 = vsyncpa [#allocation3], 0  ;;  %1207 = vmatpush3.msra.mxu0 %v50_v4  ;;  %v1439_v9 = vld [vmem:[%s1801_s0 + $0x8] sm:$0xff]  ;;  %278 = vperm.xlu0 %1279, %v269_v8   ;;  %v270_v11 = vld [vmem:[%s1803_s2 + $0x10] sm:$0xff]  ;;  %v266_v26 = vlaneseq  ;;  %vm352_vm1 = vcmask 130048   ;;  %v1336_v30 = vmov 0.0  }
   0x8   :  { %v311_v10 = vld [vmem:[%s1804_s3 + $0x8] sm:$0xff]  ;;  %1208 = vmatprep.subr.mxu0 %v49_v7  ;;  %v271_v12 = vld [vmem:[%s1803_s2 + $0x18] sm:$0xff]  ;;  %v312_v13 = vld [vmem:[%s1804_s3 + $0x10] sm:$0xff]  ;;  %s1337_s13 = smov 64   ;;  %vm739_vm14 = vcmask 392192  }
   0x9   :  { %1209 = vmatpush3.msra.mxu0 %v49_v7  ;;  %320 = vperm.xlu1 %1280, %v311_v10   ;;  %v272_v14 = vld [vmem:[%s1803_s2 + $0x20] sm:$0xff]  ;;  %v313_v15 = vld [vmem:[%s1804_s3 + $0x18] sm:$0xff]  ;;  %v144_v17 = vld [vmem:[%s1809_s8 + $0x10] sm:$0xff]  ;;  %v1515_v27 = vand.u32 127, %v266_v26 }
   0xa   :  { %1211 = vmatmul.mubr.msk.f32.vlgmr.msra.gmra.mxu0 %vm60_vm0, %v1439_v9  ;;  %v145_v16 = vld [vmem:[%s1809_s8 + $0x18] sm:$0xff]  ;;  %v1470_v18 = vld [vmem:[%s1802_s1] sm:$0xff]  ;;  %v143_v19 = vld [vmem:[%s1809_s8 + $0x8] sm:$0xff] }
   0xb   :  { %281 = vperm.xlu0 %1279, %v270_v11   ;;  %1213 = vmatprep.subr.mxu1 %v145_v16  ;;  %v142_v20 = vld [vmem:[%s1809_s8] sm:$0xff]  ;;  %v1483_v21 = vld [vmem:[%s1802_s1 + $0x8] sm:$0xff]  ;;  %v1488_v22 = vld [vmem:[%s1802_s1 + $0x10] sm:$0xff]  ;;  %s1340_s8 = smov [#allocation2]  }
   0xc   :  { %1214 = vmatpush3.msra.mxu1 %v145_v16  ;;  %1221 = vmatprep.mubr.msk.f32.mxu1 %vm60_vm0, %v1470_v18  ;;  %v1497_v23 = vld [vmem:[%s1802_s1 + $0x18] sm:$0xff]  ;;  %v1502_v24 = vld [vmem:[%s1802_s1 + $0x20] sm:$0xff]  ;;  %v1511_v25 = vld [vmem:[%s1802_s1 + $0x28] sm:$0xff] }
   0xd   :  { %284 = vperm.xlu1 %1280, %v271_v12   ;;  %1215 = vmatprep.subr.mxu1 %v144_v17  ;;  %v1113_v35 = vld [vmem:[%s1808_s7] ss:$0 sm:$0xff]  ;;  %v273_v43 = vld [vmem:[%s1803_s2 + $0x28] sm:$0xff] }
   0xe   :  { %1216 = vmatpush3.msra.mxu1 %v144_v17  ;;  %v314_v46 = vld [vmem:[%s1804_s3 + $0x20] sm:$0xff]  ;;  %v315_v47 = vld [vmem:[%s1804_s3 + $0x28] sm:$0xff]  ;;  %s1338_s3 = smov 96  }
   0xf   :  { %323 = vperm.xlu0 %1279, %v312_v13   ;;  %1217 = vmatprep.subr.mxu1 %v143_v19  ;;  %v1116_v8 = vld [vmem:[%s1810_s9] ss:$0 sm:$0xff]  ;;  %s1339_s9 = smov 32  }
  0x10   :  { %1218 = vmatpush3.msra.mxu1 %v143_v19 }
  0x11   :  { %287 = vperm.xlu1 %1280, %v272_v14   ;;  %1219 = vmatprep.subr.mxu1 %v142_v20 }
  0x12   :  { %1220 = vmatpush3.msra.mxu1 %v142_v20 }
  0x13   :  { %326 = vperm.xlu0 %1279, %v313_v15   ;;  %1222 = vmatmul.mubr.msk.f32.vlgmr.msra.gmra.mxu1 %vm60_vm0, %v1483_v21 }
  0x14   :  { %1224 = vmatprep.mubr.msk.f32.mxu1 %vm60_vm0, %v1488_v22 }
  0x17   :  { %1225 = vmatmul.mubr.msk.f32.gmra.mxu1 %vm60_vm0, %v1497_v23 }
  0x18   :  { %1227 = vmatprep.mubr.msk.f32.mxu1 %vm60_vm0, %v1502_v24 }
  0x1b   :  { %1228 = vmatmul.mubr.msk.f32.gmra.mxu1 %vm60_vm0, %v1511_v25 }
  0x7e   :  { %v276_v28 = vpop.permute.xlu0 %275 }
  0x7f   :  { %vm292_vm2 = vcmp.eq.s32.totalorder %v1515_v27, %v276_v28  ;;  %v318_v29 = vpop.permute.xlu1 %317 }
  0x80   :  { %v1123_v31 = vsel %vm292_vm2, 1.0, %v1336_v30  ;;  %vm334_vm3 = vcmp.eq.s32.totalorder %v1515_v27, %v318_v29  ;;  %vm922_vm2 = vcmask 523520  }
  0x81   :  { %v1521_v32 = vsel %vm334_vm3, 1.0, %v1336_v30  ;;  %1234 = vmatprep.mubr.msk.f32.mxu0 %vm352_vm1, %v1123_v31 }
  0x82   :  { %1247 = vmatprep.mubr.msk.f32.mxu1 %vm352_vm1, %v1521_v32  ;;  %v279_v33 = vpop.permute.xlu0 %278 }
  0x83   :  { %vm293_vm4 = vcmp.eq.s32.totalorder %v1515_v27, %v279_v33 }
  0x84   :  { %v321_v34 = vpop.permute.xlu1 %320  ;;  %v1124_v44 = vsel %vm293_vm4, 1.0, %v1336_v30 }
  0x85   :  { %vm335_vm8 = vcmp.eq.s32.totalorder %v1515_v27, %v321_v34 }
  0x86   :  { %v282_v36 = vpop.permute.xlu0 %281  ;;  %v1565_v54 = vsel %vm335_vm8, 1.0, %v1336_v30 }
  0x87   :  { %vm294_vm5 = vcmp.eq.s32.totalorder %v1515_v27, %v282_v36 }
  0x88   :  { %v285_v37 = vpop.permute.xlu1 %284  ;;  %v1125_v45 = vsel %vm294_vm5, 1.0, %v1336_v30 }
  0x89   :  { %vm295_vm6 = vcmp.eq.s32.totalorder %v1515_v27, %v285_v37 }
  0x8a   :  { %v1126_v48 = vsel %vm295_vm6, 1.0, %v1336_v30  ;;  %v324_v50 = vpop.permute.xlu0 %323 }
  0x8b   :  { %vm336_vm9 = vcmp.eq.s32.totalorder %v1515_v27, %v324_v50 }
  0x8c   :  { %v288_v42 = vpop.permute.xlu1 %287  ;;  %v1568_v55 = vsel %vm336_vm9, 1.0, %v1336_v30 }
  0x8d   :  { %vm296_vm7 = vcmp.eq.s32.totalorder %v1515_v27, %v288_v42 }
  0x8e   :  { %v1127_v49 = vsel %vm296_vm7, 1.0, %v1336_v30  ;;  %v327_v51 = vpop.permute.xlu0 %326 }
  0x8f   :  { %vm337_vm10 = vcmp.eq.s32.totalorder %v1515_v27, %v327_v51 }
  0x90   :  { %v1576_v56 = vsel %vm337_vm10, 1.0, %v1336_v30 }
  0xca   :  { %v1212_v38 = vpop.f32.mrf.mxu0 }
  0xcb   :  { %v1529_v39 = vadd.f32 %v1212_v38, %v1113_v35 }
  0xcc   :  { %v133_v40 = vpop.f32.mrf.mxu0 }
  0xcd   :  { %v1533_v41 = vadd.f32 %v1113_v35, %v133_v40  ;;  %470 = vrot.lane.b32.xlu1 %v1529_v39, %s1337_s13  ;;  %1230 = vmatprep.subr.mxu0 %v1529_v39 }
  0xce   :  { %1231 = vmatpush3.msra.mxu0 %v1529_v39 }
  0xcf   :  { %468 = vrot.lane.b32.xlu0 %v1533_v41, %s1337_s13  ;;  %1232 = vmatprep.subr.mxu0 %v1533_v41 }
  0xd0   :  { %1233 = vmatpush3.msra.mxu0 %v1533_v41 }
  0xd1   :  { %290 = vperm.xlu1 %1280, %v273_v43   ;;  %1235 = vmatmul.mubr.msk.f32.vlgmr.msra.gmra.mxu0 %vm352_vm1, %v1124_v44 }
  0xd2   :  { %1237 = vmatprep.mubr.msk.f32.mxu0 %vm352_vm1, %v1125_v45 }
  0xd3   :  { %329 = vperm.xlu0 %1279, %v314_v46   ;;  %v1223_v4 = vpop.f32.mrf.mxu1 }
  0xd4   :  { %v243_v11 = vadd.f32 %v1223_v4, %v1116_v8 }
  0xd5   :  { %332 = vperm.xlu1 %1280, %v315_v47   ;;  %1238 = vmatmul.mubr.msk.f32.gmra.mxu0 %vm352_vm1, %v1126_v48  ;;  %v237_v5 = vpop.f32.mrf.mxu1 }
  0xd6   :  { %1240 = vmatprep.mubr.msk.f32.mxu0 %vm352_vm1, %v1127_v49  ;;  %v238_v13 = vadd.f32 %v1116_v8, %v237_v5 }
  0xd7   :  { %v1226_v6 = vpop.f32.mrf.mxu1 }
  0xd8   :  { %v253_v14 = vadd.f32 %v1226_v6, %v1116_v8 }
  0xd9   :  { %v247_v7 = vpop.f32.mrf.mxu1 }
  0xda   :  { %v248_v17 = vadd.f32 %v1116_v8, %v247_v7 }
  0xdb   :  { %v1229_v10 = vpop.f32.mrf.mxu1 }
  0xdc   :  { %v263_v42 = vadd.f32 %v1229_v10, %v1116_v8 }
  0xdd   :  { %v257_v12 = vpop.f32.mrf.mxu1 }
  0xde   :  { %v258_v44 = vadd.f32 %v1116_v8, %v257_v12 }
 0x13f   :  { %v471_v52 = vpop.permute.xlu1 %470 }
 0x140   :  { %1243 = vmatprep.subr.mxu1 %v471_v52 }
 0x141   :  { %1244 = vmatpush3.msra.mxu1 %v471_v52  ;;  %v469_v53 = vpop.permute.xlu0 %468 }
 0x142   :  { %1245 = vmatprep.subr.mxu1 %v469_v53 }
 0x143   :  { %1246 = vmatpush3.msra.mxu1 %v469_v53 }
 0x144   :  { %1248 = vmatmul.mubr.msk.f32.vlgmr.msra.gmra.mxu1 %vm352_vm1, %v1565_v54 }
 0x145   :  { %1250 = vmatprep.mubr.msk.f32.mxu1 %vm352_vm1, %v1568_v55 }
 0x148   :  { %1251 = vmatmul.mubr.msk.f32.gmra.mxu1 %vm352_vm1, %v1576_v56 }
 0x14c   :  { %v291_v57 = vpop.permute.xlu1 %290 }
 0x14d   :  { %vm297_vm11 = vcmp.eq.s32.totalorder %v1515_v27, %v291_v57 }
 0x14e   :  { %v1128_v58 = vsel %vm297_vm11, 1.0, %v1336_v30  ;;  %v330_v59 = vpop.permute.xlu0 %329 }
 0x14f   :  { %vm338_vm12 = vcmp.eq.s32.totalorder %v1515_v27, %v330_v59  ;;  %1241 = vmatmul.mubr.msk.f32.gmra.mxu0 %vm352_vm1, %v1128_v58 }
 0x150   :  { %v1585_v60 = vsel %vm338_vm12, 1.0, %v1336_v30  ;;  %v333_v61 = vpop.permute.xlu1 %332 }
 0x151   :  { %vm339_vm13 = vcmp.eq.s32.totalorder %v1515_v27, %v333_v61  ;;  %1253 = vmatprep.mubr.msk.f32.mxu1 %vm352_vm1, %v1585_v60 }
 0x152   :  { %v1591_v62 = vsel %vm339_vm13, 1.0, %v1336_v30 }
 0x153   :  { %1254 = vmatmul.mubr.msk.f32.gmra.mxu1 %vm352_vm1, %v1591_v62 }
 0x191   :  { %v1236_v63 = vpop.f32.mrf.mxu0 }
 0x192   :  { %v588_v15 = vadd.f32 %v1236_v63, %v243_v11 }
 0x193   :  { %v437_v0 = vpop.f32.mrf.mxu0 }
 0x194   :  { %v587_v20 = vadd.f32 %v437_v0, %v238_v13 }
 0x195   :  { %v1239_v1 = vpop.f32.mrf.mxu0 }
 0x196   :  { %659 = vrot.lane.b32.xlu1 %v1239_v1, %s1338_s3  ;;  %v590_v29 = vadd.f32 %v1239_v1, %v253_v14 }
 0x197   :  { %v447_v3 = vpop.f32.mrf.mxu0 }
 0x198   :  { %v589_v34 = vadd.f32 %v447_v3, %v248_v17 }
 0x19a   :  { %657 = vrot.lane.b32.xlu1 %v447_v3, %s1338_s3 }
 0x204   :  { %v1249_v16 = vpop.f32.mrf.mxu1 }
 0x205   :  { %v1600_v19 = vadd.f32 %v1249_v16, %v588_v15 }
 0x206   :  { %v558_v26 = vpop.f32.mrf.mxu1 }
 0x207   :  { %v1148_v27 = vmul.f32 -1.442695, %v1600_v19  ;;  %v1603_v28 = vadd.f32 %v587_v20, %v558_v26 }
 0x208   :  { %v1252_v30 = vpop.f32.mrf.mxu1 }
 0x209   :  { %1281 = vpow2.f32 %v1148_v27  ;;  %v1147_v31 = vmul.f32 -1.442695, %v1603_v28  ;;  %v1606_v33 = vadd.f32 %v1252_v30, %v590_v29 }
 0x20a   :  { %v568_v35 = vpop.f32.mrf.mxu1 }
 0x20b   :  { %1283 = vpow2.f32 %v1147_v31  ;;  %v1150_v36 = vmul.f32 -1.442695, %v1606_v33  ;;  %v1609_v37 = vadd.f32 %v589_v34, %v568_v35 }
 0x20d   :  { %1285 = vpow2.f32 %v1150_v36  ;;  %v1149_v38 = vmul.f32 -1.442695, %v1609_v37  ;;  %v878_v36 = vld [vmem:[%s1806_s5 + $0x8] sm:$0xff] }
 0x20f   :  { %1287 = vpow2.f32 %v1149_v38  ;;  %v1242_v40 = vpop.f32.mrf.mxu0 }
 0x210   :  { %663 = vrot.lane.b32.xlu0 %v1242_v40, %s1338_s3  ;;  %v592_v45 = vadd.f32 %v1242_v40, %v263_v42  ;;  %v660_v40 = vpop.permute.xlu1 %659 }
 0x211   :  { %v457_v43 = vpop.f32.mrf.mxu0 }
 0x212   :  { %661 = vrot.lane.b32.xlu1 %v457_v43, %s1338_s3  ;;  %v591_v47 = vadd.f32 %v457_v43, %v258_v44 }
 0x213   :  { %v1255_v46 = vpop.f32.mrf.mxu1 }
 0x214   :  { %v1614_v48 = vadd.f32 %v1255_v46, %v592_v45  ;;  %v658_v43 = vpop.permute.xlu1 %657 }
 0x215   :  { %v578_v49 = vpop.f32.mrf.mxu1 }
 0x216   :  { %v1282_v50 = vpop.eup %1281  ;;  %v1152_v51 = vmul.f32 -1.442695, %v1614_v48  ;;  %v1617_v52 = vadd.f32 %v591_v47, %v578_v49  ;;  %655 = vrot.lane.b32.xlu1 %v1236_v63, %s1338_s3 }
 0x217   :  { %v618_v53 = vadd.f32 1.0, %v1282_v50 }
 0x218   :  { %v1284_v57 = vpop.eup %1283  ;;  %1289 = vpow2.f32 %v1152_v51  ;;  %v1151_v58 = vmul.f32 -1.442695, %v1617_v52 }
 0x219   :  { %1291 = vrcp.f32 %v618_v53  ;;  %v617_v59 = vadd.f32 1.0, %v1284_v57 }
 0x21a   :  { %v1286_v61 = vpop.eup %1285  ;;  %1293 = vpow2.f32 %v1151_v58  ;;  %653 = vrot.lane.b32.xlu1 %v437_v0, %s1338_s3 }
 0x21b   :  { %1295 = vrcp.f32 %v617_v59  ;;  %v620_v1 = vadd.f32 1.0, %v1286_v61 }
 0x21c   :  { %v1288_v3 = vpop.eup %1287 }
 0x21d   :  { %v619_v4 = vadd.f32 1.0, %v1288_v3  ;;  %1297 = vrcp.f32 %v620_v1 }
 0x21f   :  { %1299 = vrcp.f32 %v619_v4 }
 0x225   :  { %v1290_v5 = vpop.eup %1289 }
 0x226   :  { %v1292_v6 = vpop.eup %1291  ;;  %v622_v63 = vadd.f32 1.0, %v1290_v5 }
 0x227   :  { %v1294_v7 = vpop.eup %1293  ;;  %v636_v8 = vmax.f32 %v1292_v6, 0.0001 }
 0x228   :  { %v1296_v10 = vpop.eup %1295  ;;  %1301 = vrcp.f32 %v622_v63  ;;  %v621_v11 = vadd.f32 1.0, %v1294_v7 }
 0x229   :  { %v642_v12 = vmin.f32 %v636_v8, 0.9999  ;;  %v635_v13 = vmax.f32 %v1296_v10, 0.0001 }
 0x22a   :  { %v1298_v14 = vpop.eup %1297  ;;  %1303 = vrcp.f32 %v621_v11 }
 0x22b   :  { %685 = vrot.lane.b32.xlu0 %v642_v12, %s1339_s9  ;;  %v638_v0 = vmax.f32 %v1298_v14, 0.0001  ;;  %v641_v15 = vmin.f32 %v635_v13, 0.9999 }
 0x22c   :  { %v1300_v16 = vpop.eup %1299 }
 0x22d   :  { %v644_v17 = vmin.f32 %v638_v0, 0.9999  ;;  %683 = vrot.lane.b32.xlu1 %v641_v15, %s1339_s9  ;;  %v637_v20 = vmax.f32 %v1300_v16, 0.0001  ;;  %v864_v16 = vld [vmem:[%s1805_s4 + $0x8] sm:$0xff] }
 0x22f   :  { %689 = vrot.lane.b32.xlu0 %v644_v17, %s1339_s9  ;;  %v643_v26 = vmin.f32 %v637_v20, 0.9999  ;;  %v674_v47 = vmul.f32 %v660_v40, %v644_v17 }
 0x231   :  { %v673_v51 = vmul.f32 %v658_v43, %v643_v26 }
 0x233   :  { %687 = vrot.lane.b32.xlu0 %v643_v26, %s1339_s9 }
 0x235   :  { %v1302_v27 = vpop.eup %1301 }
 0x236   :  { %v640_v29 = vmax.f32 %v1302_v27, 0.0001 }
 0x237   :  { %v1304_v30 = vpop.eup %1303 }
 0x238   :  { %v646_v31 = vmin.f32 %v640_v29, 0.9999  ;;  %v639_v34 = vmax.f32 %v1304_v30, 0.0001  ;;  %v1156_v29 = vld [vmem:[%s1811_s10] ss:$0 sm:$0xff] }
 0x239   :  { %v1157_v30 = vld [vmem:[%s1811_s10 + $0x1] ss:$0 sm:$0xff] }
 0x23a   :  { %693 = vrot.lane.b32.xlu0 %v646_v31, %s1339_s9  ;;  %v645_v35 = vmin.f32 %v639_v34, 0.9999  ;;  %v881_v34 = vld [vmem:[%s1806_s5 + $0x20] sm:$0xff] }
 0x23e   :  { %691 = vrot.lane.b32.xlu0 %v645_v35, %s1339_s9 }
 0x25c   :  { %707 = vxpose.xlu0.b32.start [1/6] (short) (narrow) %v1521_v32, 16 }
 0x260   :  { %708 = vxpose.xlu0.b32.cont [2/6] (short) (narrow) %v1565_v54, 16 }
 0x264   :  { %709 = vxpose.xlu0.b32.cont [3/6] (short) (narrow) %v1568_v55, 16 }
 0x268   :  { %710 = vxpose.xlu0.b32.cont [4/6] (short) (narrow) %v1576_v56, 16 }
 0x26c   :  { %711 = vxpose.xlu0.b32.cont [5/6] (short) (narrow) %v1585_v60, 16 }
 0x270   :  { %712 = vxpose.xlu0.b32.end [6/6] (short) (narrow) %v1591_v62, 16 }
 0x282   :  { %v664_v38 = vpop.permute.xlu0 %663 }
 0x283   :  { %v676_v45 = vmul.f32 %v664_v38, %v646_v31  ;;  %v880_v31 = vld [vmem:[%s1806_s5 + $0x18] sm:$0xff] }
 0x284   :  { %v662_v44 = vpop.permute.xlu1 %661 }
 0x285   :  { %v675_v60 = vmul.f32 %v662_v44, %v645_v35  ;;  %v882_v35 = vld [vmem:[%s1806_s5 + $0x28] sm:$0xff] }
 0x288   :  { %v656_v55 = vpop.permute.xlu1 %655 }
 0x289   :  { %v672_v57 = vmul.f32 %v656_v55, %v642_v12 }
 0x28c   :  { %v654_v50 = vpop.permute.xlu1 %653 }
 0x28d   :  { %v671_v61 = vmul.f32 %v654_v50, %v641_v15  ;;  %v863_v15 = vld [vmem:[%s1805_s4] sm:$0xff]  ;;  %s1098_s4 = sshll.u32 %s1340_s8, 4  ;;  %s1099_s4 = int_to_ptr.vmem [resolvable:$true] %s1098_s4 }
 0x28e   :  { %s1313_s0 = scalar_lea.vmem %s1099_s4, 256  ;;  %p1318_p1 = scmp.lt.s32.totalorder %s1099_s4, %s1099_s4 }
 0x28f   :  { %p1314_p0 = scmp.ne.s32.totalorder %s1099_s4, %s1313_s0  ;;  %p1319_p2 = scmp.lt.s32.totalorder %s1313_s0, %s1313_s0 }
 0x291   :  { %p1320_p3 = por %p1319_p2, %p1318_p1 }
 0x293   :  { %p1321_p4 = pnand %p1320_p3, %p1314_p0 }
 0x299   :  { %890 = vperm.xlu0 %1279, %v878_v36  }
 0x29d   :  { %v686_v42 = vpop.permute.xlu0 %685 }
 0x29e   :  { %v702_v1 = vsel %vm60_vm0, %v672_v57, %v686_v42 }
 0x29f   :  { %v684_v59 = vpop.permute.xlu1 %683 }
 0x2a0   :  { %v701_v3 = vsel %vm60_vm0, %v671_v61, %v684_v59 }
 0x2a1   :  { %v690_v32 = vpop.permute.xlu0 %689 }
 0x2a2   :  { %v704_v53 = vsel %vm60_vm0, %v674_v47, %v690_v32 }
 0x2a5   :  { %v688_v54 = vpop.permute.xlu0 %687 }
 0x2a6   :  { %v703_v58 = vsel %vm60_vm0, %v673_v51, %v688_v54 }
 0x2ac   :  { %v694_v46 = vpop.permute.xlu0 %693 }
 0x2ad   :  { %v706_v56 = vsel %vm60_vm0, %v676_v45, %v694_v46 }
 0x2ae   :  { %1256 = vmatprep.subr.mxu0 %v706_v56 }
 0x2af   :  { %1257 = vmatpush3.msra.mxu0 %v706_v56 }
 0x2b0   :  { %v692_v62 = vpop.permute.xlu0 %691 }
 0x2b1   :  { %v705_v49 = vsel %vm60_vm0, %v675_v60, %v692_v62 }
 0x2b2   :  { %1258 = vmatprep.subr.mxu0 %v705_v49 }
 0x2b3   :  { %1259 = vmatpush3.msra.mxu0 %v705_v49 }
 0x2b4   :  { %1260 = vmatprep.subr.mxu0 %v704_v53 }
 0x2b5   :  { %1261 = vmatpush3.msra.mxu0 %v704_v53 }
 0x2b6   :  { %1262 = vmatprep.subr.mxu0 %v703_v58 }
 0x2b7   :  { %1263 = vmatpush3.msra.mxu0 %v703_v58 }
 0x2b8   :  { %1264 = vmatprep.subr.mxu0 %v702_v1 }
 0x2b9   :  { %1265 = vmatpush3.msra.mxu0 %v702_v1 }
 0x2ba   :  { %1266 = vmatprep.subr.mxu0 %v701_v3 }
 0x2bb   :  { %1267 = vmatpush3.msra.mxu0 %v701_v3 }
 0x2d8   :  { %v723_v4 = vpop.trf.xlu0 }
 0x2d9   :  { %1268 = vmatprep.mubr.msk.f32.mxu0 %vm739_vm14, %v723_v4 }
 0x2dc   :  { %v724_v5 = vpop.trf.xlu0 }
 0x2dd   :  { %1269 = vmatmul.mubr.msk.f32.vlgmr.msra.gmra.mxu0 %vm739_vm14, %v724_v5 }
 0x39d   :  { %v1270_v6 = vpop.f32.mrf.mxu0 }
 0x39e   :  { %vm822_vm1 = vcmp.gt.f32.partialorder %v1270_v6, 0.0 }
 0x39f   :  { %v812_v63 = vpop.f32.mrf.mxu0  ;;  %v824_v8 = vsel %vm822_vm1, %v1270_v6, 1.0 }
 0x3a0   :  { %vm821_vm15 = vcmp.gt.f32.partialorder %v812_v63, 0.0 }
 0x3a1   :  { %v823_v7 = vsel %vm821_vm15, %v812_v63, 1.0 }
 0x3a2   :  { %827 = vrot.lane.b32.xlu1 %v823_v7, %s1338_s3 }
 0x3a6   :  { %829 = vrot.lane.b32.xlu1 %v824_v8, %s1338_s3 }
 0x414   :  { %v828_v10 = vpop.permute.xlu1 %827 }
 0x415   :  { %1305 = vrcp.f32 %v828_v10 }
 0x418   :  { %v830_v11 = vpop.permute.xlu1 %829 }
 0x419   :  { %1307 = vrcp.f32 %v830_v11 }
 0x422   :  { %v1306_v12 = vpop.eup %1305 }
 0x423   :  { %v834_v13 = vmul.f32 %v1306_v12, %v812_v63 }
 0x425   :  { %839 = vrot.lane.b32.xlu1 %v834_v13, %s1338_s3 }
 0x426   :  { %v1308_v14 = vpop.eup %1307 }
 0x427   :  { %v836_v0 = vmul.f32 %v1308_v14, %v1270_v6 }
 0x429   :  { %841 = vrot.lane.b32.xlu1 %v836_v0, %s1338_s3  ;;  %v891_v0 = vpop.permute.xlu0 %890 }
 0x42d   :  { %867 = vperm.xlu1 %1280, %v863_v15  }
 0x431   :  { %872 = vperm.xlu1 %1280, %v864_v16  }
 0x435   :  { %855 = vrot.lane.b32.xlu1 %v1417_v2, %s1339_s9 }
 0x497   :  { %v840_v17 = vpop.permute.xlu1 %839 }
 0x498   :  { %v845_v27 = vadd.f32 %v840_v17, %v1533_v41  ;;  %v879_v41 = vld [vmem:[%s1806_s5 + $0x10] sm:$0xff] }
 0x49b   :  { %v842_v20 = vpop.permute.xlu1 %841 }
 0x49c   :  { %v846_v26 = vadd.f32 %v842_v20, %v1529_v39  ;;  %v877_v39 = vld [vmem:[%s1806_s5] sm:$0xff] }
 0x49e   :  { %851 = vrot.lane.b32.xlu1 %v846_v26, %s1337_s13  ;;  %v1706_v26 = vmul.f32 %v891_v0, %v1600_v19 }
 0x4a2   :  { %849 = vrot.lane.b32.xlu1 %v845_v27, %s1337_s13 }
 0x4a6   :  { %857 = vrot.lane.b32.xlu1 %v1439_v9, %s1339_s9 }
 0x4a8   :  { %v868_v36 = vpop.permute.xlu1 %867 }
 0x4aa   :  { %959 = vrot.lane.b32.xlu1 %v1156_v29, %s1339_s9 }
 0x4ac   :  { %v873_v38 = vpop.permute.xlu1 %872 }
 0x4ae   :  { %969 = vrot.lane.b32.xlu1 %v1157_v30, %s1339_s9 }
 0x4b0   :  { %v856_v40 = vpop.permute.xlu1 %855 }
 0x4b2   :  { %885 = vperm.xlu1 %1280, %v877_v39  }
 0x4b6   :  { %895 = vperm.xlu1 %1280, %v879_v41   ;;  %v1010_v41 = vmul.f32 %v1706_v26, %v1706_v26 }
 0x4ba   :  { %900 = vperm.xlu1 %1280, %v880_v31  }
 0x4be   :  { %905 = vperm.xlu1 %1280, %v881_v34  }
 0x4c2   :  { %910 = vperm.xlu1 %1280, %v882_v35  }
 0x510   :  { %v852_v42 = vpop.permute.xlu1 %851 }
 0x514   :  { %v850_v43 = vpop.permute.xlu1 %849 }
 0x515   :  { %v861_v32 = vsel %vm821_vm15, %v850_v43, %v856_v40 }
 0x516   :  { %v1687_v44 = vmul.f32 %v868_v36, %v861_v32 }
 0x518   :  { %v858_v54 = vpop.permute.xlu1 %857  ;;  %v932_v55 = vmul.f32 %v1687_v44, %v1687_v44  ;;  %v923_v56 = vsel %vm922_vm2, %v1687_v44, 0.0 }
 0x519   :  { %v862_v45 = vsel %vm822_vm1, %v852_v42, %v858_v54  ;;  %v1016_v42 = vsel %vm60_vm0, %v1010_v41, 0.0 }
 0x51a   :  { %v1692_v46 = vmul.f32 %v873_v38, %v862_v45  ;;  %v934_v49 = vsel %vm922_vm2, %v932_v55, 0.0 }
 0x51c   :  { %v924_v60 = vsel %vm922_vm2, %v1692_v46, 0.0  ;;  %v933_v62 = vmul.f32 %v1692_v46, %v1692_v46  ;;  %v1698_v59 = vpop.permute.xlu1 %959 }
 0x51d   :  { %v925_v47 = vadd.f32 %v924_v60, %v923_v56 }
 0x51e   :  { %v935_v50 = vsel %vm922_vm2, %v933_v62, 0.0 }
 0x51f   :  { %v926_v51 = vrot.slane %v925_v47, 4  ;;  %v936_v53 = vadd.f32 %v935_v50, %v934_v49 }
 0x520   :  { %v1700_v63 = vpop.permute.xlu1 %969 }
 0x521   :  { %v927_v57 = vadd.f32 %v926_v51, %v925_v47  ;;  %v937_v58 = vrot.slane %v936_v53, 4 }
 0x523   :  { %v928_v61 = vrot.slane %v927_v57, 2  ;;  %v938_v1 = vadd.f32 %v937_v58, %v936_v53 }
 0x525   :  { %v929_v3 = vadd.f32 %v928_v61, %v927_v57  ;;  %v939_v4 = vrot.slane %v938_v1, 2 }
 0x527   :  { %v940_v5 = vadd.f32 %v939_v4, %v938_v1  ;;  %v930_v6 = vrot.slane %v929_v3, 1 }
 0x529   :  { %v941_v7 = vrot.slane %v940_v5, 1  ;;  %v931_v8 = vadd.f32 %v930_v6, %v929_v3 }
 0x52b   :  { %v942_v10 = vadd.f32 %v941_v7, %v940_v5  ;;  %v943_v11 = vmul.f32 0.0625, %v931_v8 }
 0x52d   :  { %v944_v12 = vmul.f32 0.0625, %v942_v10  ;;  %v945_v13 = vmul.f32 %v943_v11, %v943_v11  ;;  %v886_v14 = vpop.permute.xlu1 %885  ;;  %v948_v61 = vsub.f32 %v1687_v44, %v943_v11  ;;  %v949_v1 = vsub.f32 %v1692_v46, %v943_v11 }
 0x52e   :  { %v1703_v16 = vmul.f32 %v886_v14, %v1603_v28 }
 0x52f   :  { %v946_v15 = vsub.f32 %v944_v12, %v945_v13 }
 0x530   :  { %v1009_v30 = vmul.f32 %v1703_v16, %v1703_v16  ;;  %v992_v28 = vsel %vm60_vm0, %v1703_v16, 0.0 }
 0x531   :  { %v947_v17 = vmax.f32 %v946_v15, 0.0  ;;  %v896_v20 = vpop.permute.xlu1 %895 }
 0x532   :  { %v1709_v27 = vmul.f32 %v896_v20, %v1609_v37  ;;  %v993_v37 = vsel %vm60_vm0, %v1706_v26, 0.0  ;;  %v1015_v34 = vsel %vm60_vm0, %v1009_v30, 0.0 }
 0x533   :  { %v950_v29 = vadd.f32 1e-05, %v947_v17  ;;  %v994_v38 = vadd.f32 %v993_v37, %v992_v28  ;;  %v1017_v54 = vadd.f32 %v1016_v42, %v1015_v34 }
 0x534   :  { %v1011_v31 = vmul.f32 %v1709_v27, %v1709_v27  ;;  %v995_v35 = vsel %vm60_vm0, %v1709_v27, 0.0 }
 0x535   :  { %1309 = vrsqrt.f32 %v950_v29  ;;  %v901_v39 = vpop.permute.xlu1 %900  ;;  %v996_v45 = vadd.f32 %v995_v35, %v994_v38 }
 0x536   :  { %v1720_v19 = vmul.f32 %v901_v39, %v1606_v33  ;;  %v1018_v43 = vsel %vm60_vm0, %v1011_v31, 0.0 }
 0x537   :  { %v1019_v62 = vadd.f32 %v1018_v43, %v1017_v54 }
 0x538   :  { %v1012_v36 = vmul.f32 %v1720_v19, %v1720_v19  ;;  %v997_v33 = vsel %vm60_vm0, %v1720_v19, 0.0 }
 0x539   :  { %v906_v40 = vpop.permute.xlu1 %905  ;;  %v998_v47 = vadd.f32 %v997_v33, %v996_v45  ;;  %v1160_v45 = vld [vmem:[%s1811_s10 + $0x2] ss:$0 sm:$0xff] }
 0x53a   :  { %v1734_v32 = vmul.f32 %v906_v40, %v1617_v52  ;;  %v1020_v55 = vsel %vm60_vm0, %v1012_v36, 0.0 }
 0x53b   :  { %v1021_v53 = vadd.f32 %v1020_v55, %v1019_v62 }
 0x53c   :  { %v999_v56 = vsel %vm60_vm0, %v1734_v32, 0.0  ;;  %v1013_v60 = vmul.f32 %v1734_v32, %v1734_v32 }
 0x53d   :  { %v911_v49 = vpop.permute.xlu1 %910  ;;  %v1000_v52 = vadd.f32 %v999_v56, %v998_v47 }
 0x53e   :  { %v1022_v50 = vsel %vm60_vm0, %v1013_v60, 0.0  ;;  %v918_v51 = vmul.f32 %v911_v49, %v1614_v48 }
 0x53f   :  { %v1023_v3 = vadd.f32 %v1022_v50, %v1021_v53 }
 0x540   :  { %v1001_v57 = vsel %vm60_vm0, %v918_v51, 0.0  ;;  %v1014_v58 = vmul.f32 %v918_v51, %v918_v51 }
 0x541   :  { %v1002_v4 = vadd.f32 %v1001_v57, %v1000_v52 }
 0x542   :  { %v1310_v5 = vpop.eup %1309  ;;  %v1024_v6 = vsel %vm60_vm0, %v1014_v58, 0.0 }
 0x543   :  { %v952_v7 = vmul.f32 %v1310_v5, %v948_v61  ;;  %v953_v8 = vmul.f32 %v1310_v5, %v949_v1  ;;  %v1003_v10 = vrot.slane %v1002_v4, 4  ;;  %v1025_v12 = vadd.f32 %v1024_v6, %v1023_v3 }
 0x545   :  { %v962_v48 = vmul.f32 %v1698_v59, %v952_v7  ;;  %v963_v13 = vmul.f32 %v1698_v59, %v953_v8  ;;  %v1004_v14 = vadd.f32 %v1003_v10, %v1002_v4  ;;  %v1026_v0 = vrot.slane %v1025_v12, 4 }
 0x547   :  { %v972_v15 = vadd.f32 %v1700_v63, %v962_v48  ;;  %v1005_v44 = vrot.slane %v1004_v14, 2  ;;  %v1027_v17 = vadd.f32 %v1026_v0, %v1025_v12  ;;  %v973_v46 = vadd.f32 %v1700_v63, %v963_v13 }
 0x549   :  { %v974_v11 = vmax.f32 %v972_v15, 0.0  ;;  %v1006_v20 = vadd.f32 %v1005_v44, %v1004_v14  ;;  %v1028_v29 = vrot.slane %v1027_v17, 2  ;;  %v975_v41 = vmax.f32 %v973_v46, 0.0 }
 0x54b   :  { %v1007_v30 = vrot.slane %v1006_v20, 1  ;;  %v1029_v39 = vadd.f32 %v1028_v29, %v1027_v17  ;;  %978 = vrot.lane.b32.xlu1 %v974_v11, %s1338_s3 }
 0x54d   :  { %v1008_v28 = vadd.f32 %v1007_v30, %v1006_v20  ;;  %v1030_v31 = vrot.slane %v1029_v39, 1 }
 0x54f   :  { %v1031_v37 = vadd.f32 %v1030_v31, %v1029_v39  ;;  %v1032_v59 = vmul.f32 0.020833334, %v1008_v28  ;;  %980 = vrot.lane.b32.xlu1 %v975_v41, %s1338_s3 }
 0x551   :  { %v1033_v34 = vmul.f32 0.020833334, %v1031_v37  ;;  %v1034_v35 = vmul.f32 %v1032_v59, %v1032_v59  ;;  %v1037_v63 = vsub.f32 %v1703_v16, %v1032_v59  ;;  %v1038_v42 = vsub.f32 %v1706_v26, %v1032_v59  ;;  %v1161_v16 = vld [vmem:[%s1811_s10 + $0x3] ss:$0 sm:$0xff] }
 0x552   :  { %v1039_v43 = vsub.f32 %v1709_v27, %v1032_v59  ;;  %v1040_v33 = vsub.f32 %v1720_v19, %v1032_v59  ;;  %v1041_v55 = vsub.f32 %v1734_v32, %v1032_v59  ;;  %v1042_v56 = vsub.f32 %v918_v51, %v1032_v59 }
 0x553   :  { %v1035_v36 = vsub.f32 %v1033_v34, %v1034_v35 }
 0x555   :  { %v1036_v38 = vmax.f32 %v1035_v36, 0.0 }
 0x557   :  { %v1043_v40 = vadd.f32 1e-05, %v1036_v38 }
 0x559   :  { %1311 = vrsqrt.f32 %v1043_v40 }
 0x566   :  { %v1312_v54 = vpop.eup %1311 }
 0x567   :  { %v1045_v60 = vmul.f32 %v1312_v54, %v1037_v63  ;;  %v1046_v62 = vmul.f32 %v1312_v54, %v1038_v42  ;;  %v1047_v47 = vmul.f32 %v1312_v54, %v1039_v43  ;;  %v1048_v49 = vmul.f32 %v1312_v54, %v1040_v33 }
 0x568   :  { %v1049_v26 = vmul.f32 %v1312_v54, %v1041_v55  ;;  %v1050_v27 = vmul.f32 %v1312_v54, %v1042_v56 }
 0x569   :  { %v1057_v50 = vmul.f32 %v1160_v45, %v1045_v60  ;;  %v1058_v19 = vmul.f32 %v1160_v45, %v1046_v62  ;;  %v1059_v53 = vmul.f32 %v1160_v45, %v1047_v47  ;;  %v1060_v52 = vmul.f32 %v1160_v45, %v1048_v49 }
 0x56a   :  { %v1061_v57 = vmul.f32 %v1160_v45, %v1049_v26  ;;  %v1062_v58 = vmul.f32 %v1160_v45, %v1050_v27 }
 0x56b   :  { %v1069_v61 = vadd.f32 %v1161_v16, %v1057_v50  ;;  %v1070_v1 = vadd.f32 %v1161_v16, %v1058_v19  ;;  %v1071_v32 = vadd.f32 %v1161_v16, %v1059_v53  ;;  %v1072_v51 = vadd.f32 %v1161_v16, %v1060_v52 }
 0x56c   :  { %v1073_v3 = vadd.f32 %v1161_v16, %v1061_v57  ;;  %v1074_v4 = vadd.f32 %v1161_v16, %v1062_v58 }
 0x56d   :  { %v1075_v5 = vmax.f32 %v1069_v61, 0.0  ;;  %v1076_v6 = vmax.f32 %v1070_v1, 0.0  ;;  %v1077_v7 = vmax.f32 %v1071_v32, 0.0  ;;  %v1078_v8 = vmax.f32 %v1072_v51, 0.0 }
 0x56e   :  { %v1079_v10 = vmax.f32 %v1073_v3, 0.0  ;;  %v1080_v12 = vmax.f32 %v1074_v4, 0.0 }
 0x56f   :  { %v1081_v48 = vadd.f32 %v1075_v5, %v1470_v18  ;;  %v1082_v13 = vadd.f32 %v1076_v6, %v1483_v21  ;;  %v1083_v14 = vadd.f32 %v1077_v7, %v1488_v22  ;;  %v1084_v0 = vadd.f32 %v1078_v8, %v1497_v23 }
 0x570   :  { %v1085_v15 = vadd.f32 %v1079_v10, %v1502_v24  ;;  %v1086_v44 = vadd.f32 %v1080_v12, %v1511_v25 }
 0x571   :  { %1087 = vst.msk [vmem:[%s1813_s12] sm:$0xff] %vm60_vm0, %v1081_v48  ;;  %1088 = vst.msk [vmem:[%s1813_s12 + $0x8] sm:$0xff] %vm60_vm0, %v1082_v13 }
 0x572   :  { %1089 = vst.msk [vmem:[%s1813_s12 + $0x10] sm:$0xff] %vm60_vm0, %v1083_v14  ;;  %1090 = vst.msk [vmem:[%s1813_s12 + $0x18] sm:$0xff] %vm60_vm0, %v1084_v0 }
 0x573   :  { %1091 = vst.msk [vmem:[%s1813_s12 + $0x20] sm:$0xff] %vm60_vm0, %v1085_v15  ;;  %1092 = vst.msk [vmem:[%s1813_s12 + $0x28] sm:$0xff] %vm60_vm0, %v1086_v44 }
 0x5bd   :  { %v979_v18 = vpop.permute.xlu1 %978 }
 0x5be   :  { %v984_v21 = vadd.f32 %v979_v18, %v1417_v2 }
 0x5c0   :  { %986 = vst.msk [vmem:[#allocation2] sm:$0xff] %vm60_vm0, %v984_v21 }
 0x5c1   :  { %v981_v22 = vpop.permute.xlu1 %980 }
 0x5c2   :  { %v985_v23 = vadd.f32 %v981_v22, %v1439_v9 }
 0x5c4   :  { %987 = vst.msk [vmem:[#allocation2 + $0x8] sm:$0xff] %vm60_vm0, %v985_v23 }
 0x5c5   :  { %1324 = shalt.err (!%p1321_p4)
}
 0x5c6   :  { %s1341_s12 = smov 128   ;;  %s1342_s26 = smov 8  }
 0x5c7   :  { %1104 = dma.vmem_to_hbm [thread:$0]  %s1099_s4, 256, %s1812_s11, [#allocation3], %s1341_s12, %s1341_s12, %s1342_s26  }
 0x5c8   :  { %1333 = dma.done.wait [#allocation3], 256  }
 0x5c9   :  { %1334 = vsyncadd [#allocation3], 4294967040 }
 0x5ca   :  { %1112 = vsyncpa [#allocation3], 1 }

</bundles_post_ra>
